<compile_context>
chip_gen: v7x
topology: tpu7x:2x2x1
jax: 0.10.0
libtpu: 0.0.40
codegen_flags: <defaults>
</compile_context>

<pallas_src>
import jax
import jax.numpy as jnp
from jax.experimental import pallas as pl
from jax.experimental.pallas import tpu as pltpu

MASK = -1.0
TEMPERATURE = 0.1


def _round_up(x, m):
    return (x + m - 1) // m * m


def _softmax_pool_kernel(x_ref, o_ref):
    # x_ref: (TR, N) tile; o_ref: (TR, 1) tile.
    x = x_ref[...].astype(jnp.float32)
    masked = jnp.where(x == MASK, -jnp.inf, x)
    z = masked * (1.0 / TEMPERATURE)                 # VPU multiply, not divide
    m = jnp.max(z, axis=-1, keepdims=True)           # XLU cross-lane reduce
    e = jnp.exp(z - m)                               # EUP
    num = jnp.sum(e * masked, axis=-1, keepdims=True)  # keeps torch NaN behavior
    den = jnp.sum(e, axis=-1, keepdims=True)
    # Reciprocal only on the (TR, 1) column (cheap).  approx=False keeps the
    # result within 1e-5 of the exact reference; flip to approx=True for bf16
    # outputs / looser tolerances.
    o_ref[...] = (num * pl.reciprocal(den, approx=False)).astype(o_ref.dtype)


def softmax_pooling(sims, *, tile_rows=512):
    """sims: (B, M, N) float array -> (B, M)."""
    assert sims.ndim == 3
    B, M, N = sims.shape
    R = B * M
    x2d = sims.reshape(R, N)
    itemsize = jnp.dtype(x2d.dtype).itemsize

    # Sublane alignment: f32 packs 8 rows/vreg, bf16 packs 16, int8/fp8 pack 32.
    row_align = {4: 8, 2: 16, 1: 32}.get(itemsize, 8)

    # Cap the tile so the (double-buffered) input block stays well inside the
    # scoped VMEM budget on every generation (v7x has only 64 MiB physical).
    max_in_bytes_per_buffer = 8 * 2**20
    tr_cap = max(row_align,
                 (max_in_bytes_per_buffer // (N * itemsize)) // row_align * row_align)
    tr = min(_round_up(tile_rows, row_align), tr_cap, _round_up(R, row_align))

    # Pad rows to a tile multiple (zero rows give finite, ignored outputs).
    R_pad = _round_up(R, tr)
    if R_pad != R:
        x2d = jnp.pad(x2d, ((0, R_pad - R), (0, 0)))

    grid = (R_pad // tr,)
    tile_bytes = tr * N * itemsize
    vmem_limit = int(min(48 * 2**20, max(8 * 2**20, 8 * tile_bytes)))

    out2d = pl.pallas_call(
        _softmax_pool_kernel,
        out_shape=jax.ShapeDtypeStruct((R_pad, 1), sims.dtype),
        grid_spec=pltpu.PrefetchScalarGridSpec(
            num_scalar_prefetch=0,
            grid=grid,
            in_specs=[pl.BlockSpec((tr, N), lambda i: (i, 0))],
            out_specs=pl.BlockSpec((tr, 1), lambda i: (i, 0)),
        ),
        compiler_params=pltpu.CompilerParams(
            dimension_semantics=("parallel",),
            vmem_limit_bytes=vmem_limit,
        ),
        cost_estimate=pl.CostEstimate(
            flops=int(6 * R_pad * N),
            transcendentals=int(R_pad * N),
            bytes_accessed=int(R_pad * N * itemsize + R_pad * itemsize),
        ),
    )(x2d)

    return out2d[:R, 0].reshape(B, M)


def softmax_pooling_ref(sims):
    masked = jnp.where(sims == MASK, -jnp.inf, sims)
    w = jax.nn.softmax(masked / TEMPERATURE, axis=-1)
    return jnp.sum(w * masked, axis=-1)


if __name__ == "__main__":
    root = jax.random.PRNGKey(0)
    k0, k1 = jax.random.split(root)

    # Shape implied by the module: (batch, rows, candidates).
    B, M, N = 2, 16, 128
    sims = jax.random.normal(k0, (B, M, N), dtype=jnp.float32)
    # Exercise the masking path: the whole row (0, 0) becomes NaN, matching
    # the PyTorch module (weight 0 * value -inf = NaN).
    sims = sims.at[0, 0, 0].set(MASK)

    out = jax.block_until_ready(softmax_pooling(sims))
    ref = softmax_pooling_ref(sims)
    assert out.shape == (B, M)
    assert jnp.allclose(out, ref, atol=1e-5, rtol=1e-5, equal_nan=True)

    # Non-tile-multiple row count exercises the padding path (R = 39 rows).
    B2, M2, N2 = 3, 13, 128
    sims2 = jax.random.normal(k1, (B2, M2, N2), dtype=jnp.float32)
    out2 = jax.block_until_ready(softmax_pooling(sims2, tile_rows=16))
    ref2 = softmax_pooling_ref(sims2)
    assert out2.shape == (B2, M2)
    assert jnp.allclose(out2, ref2, atol=1e-5, rtol=1e-5)

    print("KERNEL_OK")
</pallas_src>

<mosaic_0001>
module attributes {stable_mosaic.version = 11 : i64} {
  func.func @_softmax_pool_kernel(%arg0: i32, %arg1: memref<32x128xf32, #tpu.memory_space<vmem>>, %arg2: memref<32x1xf32, #tpu.memory_space<vmem>>) attributes {dimension_semantics = [#tpu.dimension_semantics<parallel>], iteration_bounds = array<i64: 1>, scalar_prefetch = 0 : i64, scratch_operands = 0 : i64, tpu.core_type = #tpu.core_type<tc>, window_params = [{transform_indices = @transform_0, window_bounds = array<i64: 32, 128>}, {transform_indices = @transform_1, window_bounds = array<i64: 32, 1>}]} {
    %c0 = arith.constant 0 : index
    %c0_0 = arith.constant 0 : index
    %0 = vector.load %arg1[%c0, %c0_0] : memref<32x128xf32, #tpu.memory_space<vmem>>, vector<32x128xf32>
    %cst = arith.constant -1.000000e+00 : f32
    %1 = vector.broadcast %cst : f32 to vector<32x128xf32>
    %2 = arith.cmpf oeq, %0, %1 : vector<32x128xf32>
    %cst_1 = arith.constant 0xFF800000 : f32
    %3 = vector.broadcast %cst_1 : f32 to vector<32x128xf32>
    %4 = arith.select %2, %3, %0 : vector<32x128xi1>, vector<32x128xf32>
    %cst_2 = arith.constant 1.000000e+01 : f32
    %5 = vector.broadcast %cst_2 : f32 to vector<32x128xf32>
    %6 = arith.mulf %4, %5 : vector<32x128xf32>
    %cst_3 = arith.constant dense<0xFF800000> : vector<32xf32>
    %7 = vector.multi_reduction <maximumf>, %6, %cst_3 [1] : vector<32x128xf32> to vector<32xf32>
    %8 = vector.shape_cast %7 : vector<32xf32> to vector<32x1xf32>
    %9 = vector.broadcast %8 : vector<32x1xf32> to vector<32x128xf32>
    %10 = arith.subf %6, %9 : vector<32x128xf32>
    %11 = math.exp %10 : vector<32x128xf32>
    %12 = arith.mulf %11, %4 : vector<32x128xf32>
    %cst_4 = arith.constant dense<0.000000e+00> : vector<32xf32>
    %13 = vector.multi_reduction <add>, %12, %cst_4 [1] : vector<32x128xf32> to vector<32xf32>
    %14 = vector.shape_cast %13 : vector<32xf32> to vector<32x1xf32>
    %cst_5 = arith.constant dense<0.000000e+00> : vector<32xf32>
    %15 = vector.multi_reduction <add>, %11, %cst_5 [1] : vector<32x128xf32> to vector<32xf32>
    %16 = vector.shape_cast %15 : vector<32xf32> to vector<32x1xf32>
    %17 = tpu.reciprocal %16 : vector<32x1xf32> -> vector<32x1xf32>
    %18 = arith.mulf %14, %17 : vector<32x1xf32>
    %c0_6 = arith.constant 0 : index
    %c0_7 = arith.constant 0 : index
    %19 = vector.load %arg2[%c0_6, %c0_7] : memref<32x1xf32, #tpu.memory_space<vmem>>, vector<32x1xf32>
    tpu.vector_store %arg2[%c0_6, %c0_7], %18 {strides = array<i32>} : memref<32x1xf32, #tpu.memory_space<vmem>>, vector<32x1xf32>,
    return
  }
  func.func @transform_0(%arg0: i32) -> (i32, i32) {
    %c0_i32 = arith.constant 0 : i32
    %c0_i32_0 = arith.constant 0 : i32
    return %arg0, %c0_i32 : i32, i32
  }
  func.func @transform_1(%arg0: i32) -> (i32, i32) {
    %c0_i32 = arith.constant 0 : i32
    %c0_i32_0 = arith.constant 0 : i32
    return %arg0, %c0_i32 : i32, i32
  }
}

</mosaic_0001>

<bundles_post_ra>
// kernel: tpu_custom_call.1
= control target key start
LH: loop header
LB: loop body
LE: loop exit
PB: predicated region body
PF: predicated region fallthrough
CT: control target
= control target key end

     0   :  { %6 = vsyncpa [#allocation3], 0  ;;  %s139_s6 = smov [#allocation2]   ;;  %s176_s0 = inlined_call_operand.hbm [shape: f32[32,128], index: 0, kind: input, shape index: {}]   ;;  %s177_s1 = inlined_call_operand.vmem [shape: f32[32,1], index: 1, kind: output, shape index: {}]  }
   0x1   :  { %s12_s7 = sshll.u32 %s139_s6, 4  ;;  %s115_s10 = scalar_lea.hbm %s176_s0, 512  ;;  %s13_s7 = int_to_ptr.vmem [resolvable:$true] %s12_s7 }
   0x2   :  { %p116_p0 = scmp.ne.s32.totalorder %s176_s0, %s115_s10  ;;  %p119_p1 = scmp.lt.u32.totalorder %s115_s10, %s176_s0 }
   0x4   :  { %p121_p2 = pnand %p119_p1, %p116_p0 }
   0x6   :  { %124 = shalt.err (!%p121_p2)
}
   0x7   :  { %s125_s15 = scalar_lea.vmem %s13_s7, 512  ;;  %p130_p4 = scmp.lt.s32.totalorder %s13_s7, %s13_s7 }
   0x8   :  { %p126_p3 = scmp.ne.s32.totalorder %s13_s7, %s125_s15  ;;  %p131_p5 = scmp.lt.s32.totalorder %s125_s15, %s125_s15 }
   0xa   :  { %p132_p6 = por %p131_p5, %p130_p4 }
   0xc   :  { %p133_p7 = pnand %p132_p6, %p126_p3 }
   0xe   :  { %136 = shalt.err (!%p133_p7)
}
   0xf   :  { %s140_s16 = smov 128   ;;  %s141_s17 = smov 8  }
  0x10   :  { %18 = dma.hbm_to_vmem [thread:$0]  %s176_s0, 512, %s13_s7, [#allocation3], %s140_s16, %s140_s16, %s141_s17  }
  0x11   :  { %137 = dma.done.wait [#allocation3], 512  }
  0x12   :  { %138 = vsyncadd [#allocation3], 4294966784  ;;  %v22_v0 = vld [vmem:[#allocation2] sm:$0xff]  ;;  %v24_v1 = vld [vmem:[#allocation2 + $0x10] sm:$0xff]  ;;  %vm86_vm4 = vcmask 7168  }
  0x13   :  { %v23_v2 = vld [vmem:[#allocation2 + $0x8] sm:$0xff]  ;;  %vm26_vm0 = vcmp.eq.f32.partialorder %v22_v0, -1.0  ;;  %vm28_vm1 = vcmp.eq.f32.partialorder %v24_v1, -1.0  ;;  %v25_v3 = vld [vmem:[#allocation2 + $0x18] sm:$0xff] }
  0x14   :  { %vm27_vm2 = vcmp.eq.f32.partialorder %v23_v2, -1.0  ;;  %v30_v4 = vsel %vm26_vm0, -inf, %v22_v0  ;;  %v32_v5 = vsel %vm28_vm1, -inf, %v24_v1  ;;  %vm29_vm3 = vcmp.eq.f32.partialorder %v25_v3, -1.0 }
  0x15   :  { %v31_v6 = vsel %vm27_vm2, -inf, %v23_v2  ;;  %v34_v7 = vmul.f32 10.0, %v30_v4  ;;  %v36_v8 = vmul.f32 10.0, %v32_v5  ;;  %v33_v9 = vsel %vm29_vm3, -inf, %v25_v3 }
  0x16   :  { %v35_v10 = vmul.f32 10.0, %v31_v6  ;;  %v37_v11 = vmul.f32 10.0, %v33_v9 }
  0x17   :  { %38 = vmax.xlane.f32.xlu0 %v34_v7  ;;  %42 = vmax.xlane.f32.xlu1 %v36_v8 }
  0x1b   :  { %40 = vmax.xlane.f32.xlu0 %v35_v10  ;;  %44 = vmax.xlane.f32.xlu1 %v37_v11 }
  0xa4   :  { %v39_v12 = vpop.xlane.xlu0 %38  ;;  %v43_v13 = vpop.xlane.xlu1 %42 }
  0xa5   :  { %v46_v14 = vsub.f32 %v34_v7, %v39_v12  ;;  %v48_v15 = vsub.f32 %v36_v8, %v43_v13 }
  0xa7   :  { %v50_v16 = vmul.f32 1.442695, %v46_v14  ;;  %v54_v17 = vmul.f32 1.442695, %v48_v15 }
  0xa8   :  { %v41_v18 = vpop.xlane.xlu0 %40  ;;  %v45_v19 = vpop.xlane.xlu1 %44 }
  0xa9   :  { %99 = vpow2.f32 %v50_v16  ;;  %v47_v20 = vsub.f32 %v35_v10, %v41_v18  ;;  %v49_v21 = vsub.f32 %v37_v11, %v45_v19 }
  0xaa   :  { %101 = vpow2.f32 %v54_v17 }
  0xab   :  { %v52_v22 = vmul.f32 1.442695, %v47_v20  ;;  %v56_v23 = vmul.f32 1.442695, %v49_v21 }
  0xad   :  { %103 = vpow2.f32 %v52_v22 }
  0xae   :  { %105 = vpow2.f32 %v56_v23 }
  0xb3   :  { %v100_v24 = vpop.eup %99 }
  0xb4   :  { %70 = vadd.xlane.f32.xlu0 %v100_v24  ;;  %v102_v25 = vpop.eup %101  ;;  %v58_v28 = vmul.f32 %v100_v24, %v30_v4 }
  0xb5   :  { %v60_v29 = vmul.f32 %v102_v25, %v32_v5 }
  0xb7   :  { %v104_v26 = vpop.eup %103 }
  0xb8   :  { %74 = vadd.xlane.f32.xlu0 %v102_v25  ;;  %72 = vadd.xlane.f32.xlu1 %v104_v26  ;;  %v106_v27 = vpop.eup %105  ;;  %v59_v30 = vmul.f32 %v104_v26, %v31_v6 }
  0xb9   :  { %v61_v31 = vmul.f32 %v106_v27, %v33_v9 }
  0xbc   :  { %62 = vadd.xlane.f32.xlu0 %v58_v28  ;;  %76 = vadd.xlane.f32.xlu1 %v106_v27 }
  0xc0   :  { %66 = vadd.xlane.f32.xlu0 %v60_v29  ;;  %64 = vadd.xlane.f32.xlu1 %v59_v30 }
  0xc4   :  { %68 = vadd.xlane.f32.xlu1 %v61_v31 }
 0x141   :  { %v71_v32 = vpop.xlane.xlu0 %70 }
 0x142   :  { %107 = vrcp.f32 %v71_v32 }
 0x145   :  { %v73_v33 = vpop.xlane.xlu1 %72  ;;  %v75_v34 = vpop.xlane.xlu0 %74 }
 0x146   :  { %109 = vrcp.f32 %v73_v33 }
 0x147   :  { %111 = vrcp.f32 %v75_v34 }
 0x149   :  { %v77_v35 = vpop.xlane.xlu1 %76  ;;  %v63_v36 = vpop.xlane.xlu0 %62 }
 0x14a   :  { %113 = vrcp.f32 %v77_v35 }
 0x14c   :  { %v108_v37 = vpop.eup %107 }
 0x14d   :  { %v82_v38 = vmul.f32 %v108_v37, %v63_v36  ;;  %v65_v39 = vpop.xlane.xlu1 %64  ;;  %v67_v43 = vpop.xlane.xlu0 %66 }
 0x14f   :  { %87 = vst.msk [vmem:[%s177_s1] sm:$0xff] %vm86_vm4, %v82_v38 }
 0x150   :  { %v110_v40 = vpop.eup %109 }
 0x151   :  { %v112_v41 = vpop.eup %111  ;;  %v83_v42 = vmul.f32 %v110_v40, %v65_v39  ;;  %v69_v46 = vpop.xlane.xlu1 %68 }
 0x152   :  { %v84_v44 = vmul.f32 %v112_v41, %v67_v43 }
 0x153   :  { %88 = vst.msk [vmem:[%s177_s1 + $0x8] sm:$0xff] %vm86_vm4, %v83_v42 }
 0x154   :  { %v114_v45 = vpop.eup %113  ;;  %89 = vst.msk [vmem:[%s177_s1 + $0x10] sm:$0xff] %vm86_vm4, %v84_v44 }
 0x155   :  { %v85_v47 = vmul.f32 %v114_v45, %v69_v46 }
 0x157   :  { %90 = vst.msk [vmem:[%s177_s1 + $0x18] sm:$0xff] %vm86_vm4, %v85_v47 }
 0x158   :  { %95 = vsyncpa [#allocation3], 1 }

</bundles_post_ra>
